<compile_context>
chip_gen: v6e
topology: v6e:2x2x1
jax: 0.10.0
libtpu: 0.0.40
codegen_flags: <defaults>
</compile_context>

<pallas_src>
import math

import jax
import jax.numpy as jnp
from jax import lax
from jax.experimental import pallas as pl
from jax.experimental.pallas import tpu as pltpu

LN_EPS = 1e-5  # nn.LayerNorm default


# --------------------------------------------------------------------------
# Pallas kernel: one token tile per grid step
#   (block_m, Kp) @ (Kp, E)  (bias folded into W)  ->  LayerNorm over E
#   ->  * gamma + beta
# --------------------------------------------------------------------------
def patch_embed_kernel(p_ref, w_ref, gamma_ref, beta_ref, o_ref):
    # projection (conv-as-matmul); bf16 operands, f32 accumulator.
    # bias is folded into w via the ones-column of the patch tile.
    y = jnp.dot(p_ref[...], w_ref[...], preferred_element_type=jnp.float32)

    # LayerNorm over embed_dim (lane axis): two independent lane reductions.
    inv_e = 1.0 / y.shape[-1]
    mean = jnp.sum(y, axis=-1, keepdims=True) * inv_e
    mean_sq = jnp.sum(y * y, axis=-1, keepdims=True) * inv_e
    var = mean_sq - mean * mean

    o_ref[...] = ((y - mean) * lax.rsqrt(var + LN_EPS) * gamma_ref[0]
                  + beta_ref[0]).astype(o_ref.dtype)


def overlap_patch_embed_forward(x_nchw, params, *, patch_size=7, stride=4,
                                block_m=256, out_dtype=jnp.bfloat16):
    """x_nchw: (B, Cin, H, W) f32.  Returns (tokens (B, Ho*Wo, E), Ho, Wo)."""
    B, Cin, Hin, Win = x_nchw.shape
    E = params["w"].shape[-1]
    # TODO(synk): masked-LN path + lane padding for embed_dim not a multiple of 128.
    assert E % 128 == 0, "embed_dim must be a multiple of 128 for this kernel"

    P, S, pad = patch_size, stride, patch_size // 2
    Ho = (Hin + 2 * pad - P) // S + 1
    Wo = (Win + 2 * pad - P) // S + 1
    K = P * P * Cin
    Kp = -(-(K + 1) // 128) * 128          # +1 for the folded-bias ones column

    # ---- im2col (wrapper-side layout plumbing; static slices only), in bf16 ----
    xhwc = jnp.transpose(x_nchw, (0, 2, 3, 1)).astype(jnp.bfloat16)  # (B,H,W,Cin)
    xpad = jnp.pad(xhwc, ((0, 0), (pad, pad), (pad, pad), (0, 0)))
    taps = []
    for kh in range(P):
        for kw in range(P):
            taps.append(xpad[:, kh:kh + S * Ho:S, kw:kw + S * Wo:S, :])
    patches = jnp.concatenate(taps, axis=-1)                        # (B,Ho,Wo,K)
    M = B * Ho * Wo
    patches = patches.reshape(M, K)                                 # token-major

    # ones column (folded bias) + zero pad to lane-aligned Kp
    patches = jnp.concatenate(
        [patches,
         jnp.ones((M, 1), jnp.bfloat16),
         jnp.zeros((M, Kp - K - 1), jnp.bfloat16)], axis=-1)        # (M, Kp)

    # ---- M tiling: pad token count to a multiple of block_m ----
    block_m = min(block_m, -(-M // 8) * 8)
    Mp = -(-M // block_m) * block_m
    if Mp != M:
        # NOTE: padded zero rows produce (finite) garbage through LayerNorm;
        # they are sliced off with out[:M] below.
        patches = jnp.pad(patches, ((0, Mp - M), (0, 0)))

    # ---- weight (Kp, E) bf16 with bias folded in as row K ----
    w = jnp.concatenate(
        [params["w"],                                               # (K, E)
         params["b"],                                               # (1, E) bias row
         jnp.zeros((Kp - K - 1, E), params["w"].dtype)], axis=0
    ).astype(jnp.bfloat16)                                          # (Kp, E)

    grid_steps = Mp // block_m
    # 3-deep buffering on the patch stream when the grid is long enough
    # (hides the exposed patch DMA on single-TC v5e/v6e).
    if grid_steps >= 3:
        patch_spec = pl.BlockSpec((block_m, Kp), lambda i: (i, 0),
                                  pipeline_mode=pl.Buffered(3))
    else:
        patch_spec = pl.BlockSpec((block_m, Kp), lambda i: (i, 0))

    out = pl.pallas_call(
        patch_embed_kernel,
        out_shape=jax.ShapeDtypeStruct((Mp, E), out_dtype),
        grid_spec=pltpu.PrefetchScalarGridSpec(
            num_scalar_prefetch=0,
            grid=(grid_steps,),
            in_specs=[
                patch_spec,                                         # patch tile
                pl.BlockSpec((Kp, E), lambda i: (0, 0)),            # proj weight (+bias row)
                pl.BlockSpec((1, E), lambda i: (0, 0)),             # LN gamma
                pl.BlockSpec((1, E), lambda i: (0, 0)),             # LN beta
            ],
            out_specs=pl.BlockSpec((block_m, E), lambda i: (i, 0)),
        ),
        compiler_params=pltpu.CompilerParams(
            dimension_semantics=("parallel",)),
    )(patches, w, params["gamma"], params["beta"])

    return out[:M].reshape(B, Ho * Wo, E), Ho, Wo


# --------------------------------------------------------------------------
# Deterministic parameter init (torch shapes; synthetic bias / LN affine so
# the correctness check exercises the folded-bias and gamma/beta wiring)
# --------------------------------------------------------------------------
def init_params(key, in_chans, embed_dim, patch_size=7):
    k1, k2, k3, k4 = jax.random.split(key, 4)
    fan_out = patch_size * patch_size * embed_dim
    # torch conv weight layout (E, Cin, P, P), normal(0, sqrt(2/fan_out))
    w_torch = jax.random.normal(
        k1, (embed_dim, in_chans, patch_size, patch_size),
        jnp.float32) * math.sqrt(2.0 / fan_out)
    # kernel layout: (P*P*Cin, E) with row order (kh, kw, cin) matching im2col
    w_mat = jnp.transpose(w_torch, (2, 3, 1, 0)).reshape(
        patch_size * patch_size * in_chans, embed_dim)
    return {
        "w_torch": w_torch,                                        # for reference
        "w": w_mat,
        "b": 0.05 * jax.random.normal(k2, (1, embed_dim), jnp.float32),
        "gamma": 1.0 + 0.1 * jax.random.normal(k3, (1, embed_dim), jnp.float32),
        "beta": 0.1 * jax.random.normal(k4, (1, embed_dim), jnp.float32),
    }


# --------------------------------------------------------------------------
# Pure-JAX reference mirroring the PyTorch forward (for verification)
# --------------------------------------------------------------------------
def reference_forward(x_nchw, params, *, patch_size=7, stride=4):
    pad = patch_size // 2
    conv = lax.conv_general_dilated(
        x_nchw, params["w_torch"], window_strides=(stride, stride),
        padding=((pad, pad), (pad, pad)),
        dimension_numbers=("NCHW", "OIHW", "NCHW"))
    conv = conv + params["b"][0][None, :, None, None]
    B, E, Ho, Wo = conv.shape
    tok = jnp.transpose(conv.reshape(B, E, Ho * Wo), (0, 2, 1))    # (B, N, E)
    mean = jnp.mean(tok, -1, keepdims=True)
    var = jnp.mean((tok - mean) ** 2, -1, keepdims=True)
    out = (tok - mean) / jnp.sqrt(var + LN_EPS) * params["gamma"][0] \
        + params["beta"][0]
    return out, Ho, Wo


if __name__ == "__main__":
    # Small shapes consistent with the module: Conv2d(3 -> 128, k=7, s=4, p=3)
    # on a 32x32 image -> 8x8 = 64 tokens per image, embed_dim=128 (lane-dense).
    B, Cin, Hin, Win = 2, 3, 32, 32
    E = 128

    key = jax.random.PRNGKey(0)
    kx, kp = jax.random.split(key)
    x = jax.random.normal(kx, (B, Cin, Hin, Win), jnp.float32)
    params = init_params(kp, Cin, E)

    out, H, W = overlap_patch_embed_forward(x, params)
    out = jax.block_until_ready(out)

    ref, Hr, Wr = reference_forward(x, params)
    assert (H, W) == (Hr, Wr) == (8, 8), (H, W, Hr, Wr)
    assert out.shape == (B, H * W, E), out.shape
    max_err = float(jnp.max(jnp.abs(out.astype(jnp.float32) - ref)))
    # bf16 patch matrix / weights / output (f32 accumulate + f32 LN math inside
    # the kernel) leave ~1e-2-scale deviation vs the pure-f32 reference.
    assert max_err < 5e-2, f"mismatch vs reference: {max_err}"
    print("KERNEL_OK")
</pallas_src>

<mosaic_0001>
module attributes {stable_mosaic.version = 11 : i64} {
  func.func @patch_embed_kernel(%arg0: i32, %arg1: memref<128x256xbf16, #tpu.memory_space<vmem>>, %arg2: memref<256x128xbf16, #tpu.memory_space<vmem>>, %arg3: memref<1x128xf32, #tpu.memory_space<vmem>>, %arg4: memref<1x128xf32, #tpu.memory_space<vmem>>, %arg5: memref<128x128xbf16, #tpu.memory_space<vmem>>) attributes {dimension_semantics = [#tpu.dimension_semantics<parallel>], iteration_bounds = array<i64: 1>, scalar_prefetch = 0 : i64, scratch_operands = 0 : i64, tpu.core_type = #tpu.core_type<tc>, window_params = [{transform_indices = @transform_0, window_bounds = array<i64: 128, 256>}, {pipeline_mode = #tpu.pipeline_mode<synchronous>, transform_indices = @transform_1, window_bounds = array<i64: 256, 128>}, {pipeline_mode = #tpu.pipeline_mode<synchronous>, transform_indices = @transform_2, window_bounds = array<i64: 1, 128>}, {pipeline_mode = #tpu.pipeline_mode<synchronous>, transform_indices = @transform_3, window_bounds = array<i64: 1, 128>}, {transform_indices = @transform_4, window_bounds = array<i64: 128, 128>}]} {
    %c0 = arith.constant 0 : index
    %c0_0 = arith.constant 0 : index
    %0 = vector.load %arg1[%c0, %c0_0] : memref<128x256xbf16, #tpu.memory_space<vmem>>, vector<128x256xbf16>
    %c0_1 = arith.constant 0 : index
    %c0_2 = arith.constant 0 : index
    %1 = vector.load %arg2[%c0_1, %c0_2] : memref<256x128xbf16, #tpu.memory_space<vmem>>, vector<256x128xbf16>
    %cst = arith.constant dense<0.000000e+00> : vector<128x128xf32>
    %2 = tpu.matmul %0, %1, %cst {dimension_numbers = #tpu.dot_dimension_numbers<[1], [0], [0], [1], [0, 0, 1, 1], [], []>} : vector<128x256xbf16>, vector<256x128xbf16>, vector<128x128xf32> -> vector<128x128xf32>
    %cst_3 = arith.constant dense<0.000000e+00> : vector<128xf32>
    %3 = vector.multi_reduction <add>, %2, %cst_3 [1] : vector<128x128xf32> to vector<128xf32>
    %4 = vector.shape_cast %3 : vector<128xf32> to vector<128x1xf32>
    %cst_4 = arith.constant 7.812500e-03 : f32
    %5 = vector.broadcast %cst_4 : f32 to vector<128x1xf32>
    %6 = arith.mulf %4, %5 : vector<128x1xf32>
    %7 = arith.mulf %2, %2 : vector<128x128xf32>
    %cst_5 = arith.constant dense<0.000000e+00> : vector<128xf32>
    %8 = vector.multi_reduction <add>, %7, %cst_5 [1] : vector<128x128xf32> to vector<128xf32>
    %9 = vector.shape_cast %8 : vector<128xf32> to vector<128x1xf32>
    %cst_6 = arith.constant 7.812500e-03 : f32
    %10 = vector.broadcast %cst_6 : f32 to vector<128x1xf32>
    %11 = arith.mulf %9, %10 : vector<128x1xf32>
    %12 = arith.mulf %6, %6 : vector<128x1xf32>
    %13 = arith.subf %11, %12 : vector<128x1xf32>
    %14 = vector.broadcast %6 : vector<128x1xf32> to vector<128x128xf32>
    %15 = arith.subf %2, %14 : vector<128x128xf32>
    %cst_7 = arith.constant 9.99999974E-6 : f32
    %16 = vector.broadcast %cst_7 : f32 to vector<128x1xf32>
    %17 = arith.addf %13, %16 : vector<128x1xf32>
    %18 = math.rsqrt %17 : vector<128x1xf32>
    %19 = vector.broadcast %18 : vector<128x1xf32> to vector<128x128xf32>
    %20 = arith.mulf %15, %19 : vector<128x128xf32>
    %c0_8 = arith.constant 0 : index
    %c0_9 = arith.constant 0 : index
    %21 = vector.load %arg3[%c0_8, %c0_9] : memref<1x128xf32, #tpu.memory_space<vmem>>, vector<1x128xf32>
    %22 = vector.shape_cast %21 : vector<1x128xf32> to vector<128xf32>
    %23 = vector.shape_cast %22 : vector<128xf32> to vector<1x128xf32>
    %24 = vector.broadcast %23 : vector<1x128xf32> to vector<128x128xf32>
    %25 = arith.mulf %20, %24 : vector<128x128xf32>
    %c0_10 = arith.constant 0 : index
    %c0_11 = arith.constant 0 : index
    %26 = vector.load %arg4[%c0_10, %c0_11] : memref<1x128xf32, #tpu.memory_space<vmem>>, vector<1x128xf32>
    %27 = vector.shape_cast %26 : vector<1x128xf32> to vector<128xf32>
    %28 = vector.shape_cast %27 : vector<128xf32> to vector<1x128xf32>
    %29 = vector.broadcast %28 : vector<1x128xf32> to vector<128x128xf32>
    %30 = arith.addf %25, %29 : vector<128x128xf32>
    %31 = arith.truncf %30 : vector<128x128xf32> to vector<128x128xbf16>
    %c0_12 = arith.constant 0 : index
    %c0_13 = arith.constant 0 : index
    %32 = vector.load %arg5[%c0_12, %c0_13] : memref<128x128xbf16, #tpu.memory_space<vmem>>, vector<128x128xbf16>
    tpu.vector_store %arg5[%c0_12, %c0_13], %31 {strides = array<i32>} : memref<128x128xbf16, #tpu.memory_space<vmem>>, vector<128x128xbf16>,
    return
  }
  func.func @transform_0(%arg0: i32) -> (i32, i32) {
    %c0_i32 = arith.constant 0 : i32
    %c0_i32_0 = arith.constant 0 : i32
    return %arg0, %c0_i32 : i32, i32
  }
  func.func @transform_1(%arg0: i32) -> (i32, i32) {
    %c0_i32 = arith.constant 0 : i32
    %c0_i32_0 = arith.constant 0 : i32
    %c0_i32_1 = arith.constant 0 : i32
    return %c0_i32, %c0_i32_0 : i32, i32
  }
  func.func @transform_2(%arg0: i32) -> (i32, i32) {
    %c0_i32 = arith.constant 0 : i32
    %c0_i32_0 = arith.constant 0 : i32
    %c0_i32_1 = arith.constant 0 : i32
    return %c0_i32, %c0_i32_0 : i32, i32
  }
  func.func @transform_3(%arg0: i32) -> (i32, i32) {
    %c0_i32 = arith.constant 0 : i32
    %c0_i32_0 = arith.constant 0 : i32
    %c0_i32_1 = arith.constant 0 : i32
    return %c0_i32, %c0_i32_0 : i32, i32
  }
  func.func @transform_4(%arg0: i32) -> (i32, i32) {
    %c0_i32 = arith.constant 0 : i32
    %c0_i32_0 = arith.constant 0 : i32
    return %arg0, %c0_i32 : i32, i32
  }
}

</mosaic_0001>

<bundles_post_ra>
// kernel: tpu_custom_call.1
= control target key start
LH: loop header
LB: loop body
LE: loop exit
PB: predicated region body
PF: predicated region fallthrough
CT: control target
= control target key end

     0   :  { %9 = vsyncpa [#allocation3], 0  ;;  %s1303_s0 = inlined_call_operand.hbm [shape: bf16[128,256], index: 0, kind: input, shape index: {}]   ;;  %s1304_s1 = inlined_call_operand.hbm [shape: bf16[256,128], index: 1, kind: input, shape index: {}]   ;;  %s1305_s2 = inlined_call_operand.vmem [shape: f32[1,128], index: 2, kind: input, shape index: {}]   ;;  %s1306_s3 = inlined_call_operand.vmem [shape: f32[1,128], index: 3, kind: input, shape index: {}]   ;;  %s1307_s4 = inlined_call_operand.hbm [shape: bf16[128,128], index: 4, kind: output, shape index: {}]  }
   0x1   :  { %10 = vsyncpa [#allocation6], 0 }
   0x2   :  { %11 = vsyncpa [#allocation4], 0  ;;  %s1058_s15 = smov [#allocation2]  }
   0x3   :  { %s17_s16 = sshll.u32 %s1058_s15, 4  ;;  %s18_s16 = int_to_ptr.vmem [resolvable:$true] %s17_s16 }
   0x4   :  { %s1000_s17 = scalar_lea.vmem %s18_s16, 2048  ;;  %p1005_p1 = scmp.lt.s32.totalorder %s18_s16, %s18_s16 }
   0x5   :  { %p1001_p0 = scmp.ne.s32.totalorder %s18_s16, %s1000_s17  ;;  %p1006_p2 = scmp.lt.s32.totalorder %s1000_s17, %s1000_s17 }
   0x7   :  { %p1007_p3 = por %p1006_p2, %p1005_p1 }
   0x9   :  { %p1008_p4 = pnand %p1007_p3, %p1001_p0 }
   0xb   :  { %1011 = shalt.err (!%p1008_p4)
}
   0xc   :  { %s1059_s18 = smov 128   ;;  %s1060_s19 = smov 8  }
   0xd   :  { %23 = dma.hbm_to_vmem [thread:$0]  %s1303_s0, 2048, %s18_s16, [#allocation3], %s1059_s18, %s1059_s18, %s1060_s19  }
   0xe   :  { %s1061_s22 = smov [#allocation5]  }
   0xf   :  { %s29_s23 = sshll.u32 %s1061_s22, 4  ;;  %s30_s23 = int_to_ptr.vmem [resolvable:$true] %s29_s23 }
  0x10   :  { %s1020_s24 = scalar_lea.vmem %s30_s23, 2048  ;;  %p1025_p6 = scmp.lt.s32.totalorder %s30_s23, %s30_s23 }
  0x11   :  { %p1021_p5 = scmp.ne.s32.totalorder %s30_s23, %s1020_s24  ;;  %p1026_p7 = scmp.lt.s32.totalorder %s1020_s24, %s1020_s24 }
  0x13   :  { %p1027_p8 = por %p1026_p7, %p1025_p6 }
  0x15   :  { %p1028_p9 = pnand %p1027_p8, %p1021_p5 }
  0x17   :  { %1031 = shalt.err (!%p1028_p9)
}
  0x18   :  { %s1062_s25 = smov 64   ;;  %s1063_s26 = smov 4  }
  0x19   :  { %35 = dma.hbm_to_vmem [thread:$0]  %s1304_s1, 2048, %s30_s23, [#allocation6], %s1062_s25, %s1062_s25, %s1063_s26  }
  0x1a   :  { %1052 = dma.done.wait [#allocation3], 2048  }
  0x1b   :  { %1053 = vsyncadd [#allocation3], 4294965248 }
  0x1c   :  { %1054 = dma.done.wait [#allocation6], 2048  }
  0x1d   :  { %1055 = vsyncadd [#allocation6], 4294965248  ;;  %v920_v0 = vld [vmem:[#allocation5 + $0x78] sm:$0xff]   ;;  %v922_v2 = vld [vmem:[#allocation5 + $0x70] sm:$0xff]  }
  0x1e   :  { %v921_v1 = vld [vmem:[#allocation5 + $0x38] sm:$0xff]   ;;  %833 = vmatprep.subr.bf16.mxu0 %v920_v0  ;;  %897 = vmatprep.subr.bf16.mxu1 %v920_v0  ;;  %v923_v3 = vld [vmem:[#allocation5 + $0x30] sm:$0xff]   ;;  %v924_v4 = vld [vmem:[#allocation5 + $0x68] sm:$0xff]  }
  0x1f   :  { %834 = vmatpush3.bf16.msra.mxu0 %v921_v1  ;;  %905 = vmatpush3.bf16.msra.mxu1 %v921_v1  ;;  %v925_v5 = vld [vmem:[#allocation5 + $0x28] sm:$0xff]   ;;  %v926_v6 = vld [vmem:[#allocation5 + $0x60] sm:$0xff]   ;;  %v928_v8 = vld [vmem:[#allocation5 + $0x58] sm:$0xff]  }
  0x20   :  { %835 = vmatprep.subr.bf16.mxu0 %v922_v2  ;;  %898 = vmatprep.subr.bf16.mxu1 %v922_v2  ;;  %v927_v7 = vld [vmem:[#allocation5 + $0x20] sm:$0xff]   ;;  %v929_v9 = vld [vmem:[#allocation5 + $0x18] sm:$0xff]   ;;  %v930_v10 = vld [vmem:[#allocation5 + $0x50] sm:$0xff]  }
  0x21   :  { %v938_v11 = vld [vmem:[#allocation2 + $0x4] ss:$8 sps:$4 sm:$0xff]   ;;  %v931_v13 = vld [vmem:[#allocation5 + $0x10] sm:$0xff]   ;;  %v936_v18 = vld [vmem:[#allocation2] ss:$8 sps:$4 sm:$0xff]  }
  0x22   :  { %v941_v12 = vld [vmem:[#allocation2 + $0x44] ss:$8 sps:$4 sm:$0xff]   ;;  %303 = vmatprep.mubr.bf16.mxu0 %v938_v11  ;;  %v939_v19 = vld [vmem:[#allocation2 + $0x40] ss:$8 sps:$4 sm:$0xff]   ;;  %v942_v20 = vld [vmem:[#allocation2 + $0x14] ss:$8 sps:$4 sm:$0xff]  }
  0x23   :  { %836 = vmatpush3.bf16.msra.mxu0 %v923_v3  ;;  %906 = vmatpush3.bf16.msra.mxu1 %v923_v3  ;;  %v932_v14 = vld [vmem:[#allocation5 + $0x48] sm:$0xff]   ;;  %v934_v16 = vld [vmem:[#allocation5 + $0x40] sm:$0xff]   ;;  %v945_v21 = vld [vmem:[#allocation2 + $0x54] ss:$8 sps:$4 sm:$0xff]  }
  0x24   :  { %837 = vmatprep.subr.bf16.mxu0 %v924_v4  ;;  %899 = vmatprep.subr.bf16.mxu1 %v924_v4  ;;  %v933_v15 = vld [vmem:[#allocation5 + $0x8] sm:$0xff]   ;;  %v935_v17 = vld [vmem:[#allocation5] sm:$0xff]   ;;  %v944_v22 = vld [vmem:[#allocation2 + $0x10] ss:$8 sps:$4 sm:$0xff]  }
  0x25   :  { %335 = vmatprep.mubr.bf16.mxu1 %v941_v12  ;;  %v947_v23 = vld [vmem:[#allocation2 + $0x50] ss:$8 sps:$4 sm:$0xff]   ;;  %v948_v24 = vld [vmem:[#allocation2 + $0x24] ss:$8 sps:$4 sm:$0xff]   ;;  %v950_v26 = vld [vmem:[#allocation2 + $0x20] ss:$8 sps:$4 sm:$0xff]  }
  0x26   :  { %v951_v25 = vld [vmem:[#allocation2 + $0x64] ss:$8 sps:$4 sm:$0xff]   ;;  %v953_v27 = vld [vmem:[#allocation2 + $0x60] ss:$8 sps:$4 sm:$0xff]   ;;  %v954_v28 = vld [vmem:[#allocation2 + $0x34] ss:$8 sps:$4 sm:$0xff]  }
  0x27   :  { %838 = vmatpush3.bf16.msra.mxu0 %v925_v5  ;;  %907 = vmatpush3.bf16.msra.mxu1 %v925_v5  ;;  %v957_v29 = vld [vmem:[#allocation2 + $0x74] ss:$8 sps:$4 sm:$0xff]   ;;  %v956_v30 = vld [vmem:[#allocation2 + $0x30] ss:$8 sps:$4 sm:$0xff]  }
  0x28   :  { %839 = vmatprep.subr.bf16.mxu0 %v926_v6  ;;  %900 = vmatprep.subr.bf16.mxu1 %v926_v6  ;;  %v959_v31 = vld [vmem:[#allocation2 + $0x70] ss:$8 sps:$4 sm:$0xff]  }
  0x2b   :  { %840 = vmatpush3.bf16.msra.mxu0 %v927_v7  ;;  %908 = vmatpush3.bf16.msra.mxu1 %v927_v7 }
  0x2c   :  { %841 = vmatprep.subr.bf16.mxu0 %v928_v8  ;;  %901 = vmatprep.subr.bf16.mxu1 %v928_v8 }
  0x2f   :  { %842 = vmatpush3.bf16.msra.mxu0 %v929_v9  ;;  %909 = vmatpush3.bf16.msra.mxu1 %v929_v9 }
  0x30   :  { %843 = vmatprep.subr.bf16.mxu0 %v930_v10  ;;  %902 = vmatprep.subr.bf16.mxu1 %v930_v10 }
  0x33   :  { %844 = vmatpush3.bf16.msra.mxu0 %v931_v13  ;;  %910 = vmatpush3.bf16.msra.mxu1 %v931_v13 }
  0x34   :  { %845 = vmatprep.subr.bf16.mxu0 %v932_v14  ;;  %903 = vmatprep.subr.bf16.mxu1 %v932_v14 }
  0x37   :  { %846 = vmatpush3.bf16.msra.mxu0 %v933_v15  ;;  %911 = vmatpush3.bf16.msra.mxu1 %v933_v15 }
  0x38   :  { %847 = vmatprep.subr.bf16.mxu0 %v934_v16  ;;  %904 = vmatprep.subr.bf16.mxu1 %v934_v16 }
  0x3b   :  { %848 = vmatpush3.bf16.msra.mxu0 %v935_v17  ;;  %912 = vmatpush3.bf16.msra.mxu1 %v935_v17 }
  0x3e   :  { %304 = vmatmul.mubr.bf16.vlgmr.msra.gmra.mxu0 %v936_v18  ;;  %336 = vmatmul.mubr.bf16.vlgmr.msra.gmra.mxu1 %v939_v19 }
  0x3f   :  { %311 = vmatprep.mubr.bf16.mxu0 %v942_v20  ;;  %343 = vmatprep.mubr.bf16.mxu1 %v945_v21 }
  0x46   :  { %312 = vmatmul.mubr.bf16.gmra.mxu0 %v944_v22  ;;  %344 = vmatmul.mubr.bf16.gmra.mxu1 %v947_v23 }
  0x47   :  { %319 = vmatprep.mubr.bf16.mxu0 %v948_v24  ;;  %351 = vmatprep.mubr.bf16.mxu1 %v951_v25 }
  0x4e   :  { %320 = vmatmul.mubr.bf16.gmra.mxu0 %v950_v26  ;;  %352 = vmatmul.mubr.bf16.gmra.mxu1 %v953_v27 }
  0x4f   :  { %327 = vmatprep.mubr.bf16.mxu0 %v954_v28  ;;  %359 = vmatprep.mubr.bf16.mxu1 %v957_v29 }
  0x56   :  { %328 = vmatmul.mubr.bf16.gmra.mxu0 %v956_v30  ;;  %360 = vmatmul.mubr.bf16.gmra.mxu1 %v959_v31 }
  0xfe   :  { %v849_v32 = vpop.f32.mrf.mxu0  ;;  %v873_v33 = vpop.f32.mrf.mxu1 }
 0x100   :  { %v850_v34 = vpop.f32.mrf.mxu0  ;;  %v874_v35 = vpop.f32.mrf.mxu1 }
 0x101   :  { %v1099_v36 = vadd.f32 %v850_v34, %v849_v32  ;;  %v1102_v41 = vadd.f32 %v874_v35, %v873_v33 }
 0x102   :  { %v852_v37 = vpop.f32.mrf.mxu0  ;;  %v876_v38 = vpop.f32.mrf.mxu1 }
 0x103   :  { %368 = vadd.xlane.f32.xlu0 %v1099_v36  ;;  %v416_v46 = vmul.f32 %v1099_v36, %v1099_v36  ;;  %v424_v50 = vmul.f32 %v1102_v41, %v1102_v41 }
 0x104   :  { %v853_v39 = vpop.f32.mrf.mxu0  ;;  %v877_v40 = vpop.f32.mrf.mxu1 }
 0x105   :  { %v1104_v42 = vadd.f32 %v853_v39, %v852_v37  ;;  %v1106_v43 = vadd.f32 %v877_v40, %v876_v38 }
 0x106   :  { %v855_v44 = vpop.f32.mrf.mxu0  ;;  %v879_v48 = vpop.f32.mrf.mxu1 }
 0x107   :  { %386 = vadd.xlane.f32.xlu1 %v1106_v43  ;;  %384 = vadd.xlane.f32.xlu0 %v1102_v41  ;;  %v417_v45 = vmul.f32 %v1104_v42, %v1104_v42  ;;  %v425_v49 = vmul.f32 %v1106_v43, %v1106_v43 }
 0x108   :  { %v856_v47 = vpop.f32.mrf.mxu0  ;;  %v880_v52 = vpop.f32.mrf.mxu1 }
 0x109   :  { %v1118_v53 = vadd.f32 %v856_v47, %v855_v44  ;;  %v1124_v57 = vadd.f32 %v880_v52, %v879_v48 }
 0x10a   :  { %v858_v51 = vpop.f32.mrf.mxu0  ;;  %v882_v55 = vpop.f32.mrf.mxu1 }
 0x10b   :  { %434 = vadd.xlane.f32.xlu1 %v417_v45  ;;  %432 = vadd.xlane.f32.xlu0 %v416_v46  ;;  %v418_v61 = vmul.f32 %v1118_v53, %v1118_v53  ;;  %v426_v1 = vmul.f32 %v1124_v57, %v1124_v57 }
 0x10c   :  { %v859_v54 = vpop.f32.mrf.mxu0  ;;  %v883_v58 = vpop.f32.mrf.mxu1 }
 0x10d   :  { %v1122_v56 = vadd.f32 %v859_v54, %v858_v51  ;;  %v1128_v60 = vadd.f32 %v883_v58, %v882_v55 }
 0x10e   :  { %v861_v59 = vpop.f32.mrf.mxu0  ;;  %v885_v63 = vpop.f32.mrf.mxu1 }
 0x10f   :  { %450 = vadd.xlane.f32.xlu1 %v425_v49  ;;  %448 = vadd.xlane.f32.xlu0 %v424_v50  ;;  %v419_v0 = vmul.f32 %v1122_v56, %v1122_v56  ;;  %v427_v5 = vmul.f32 %v1128_v60, %v1128_v60 }
 0x110   :  { %v862_v62 = vpop.f32.mrf.mxu0  ;;  %v886_v3 = vpop.f32.mrf.mxu1 }
 0x111   :  { %v1137_v4 = vadd.f32 %v862_v62, %v861_v59  ;;  %v1144_v9 = vadd.f32 %v886_v3, %v885_v63 }
 0x112   :  { %v864_v2 = vpop.f32.mrf.mxu0  ;;  %v888_v7 = vpop.f32.mrf.mxu1 }
 0x113   :  { %372 = vadd.xlane.f32.xlu1 %v1118_v53  ;;  %370 = vadd.xlane.f32.xlu0 %v1104_v42  ;;  %v420_v13 = vmul.f32 %v1137_v4, %v1137_v4  ;;  %v428_v17 = vmul.f32 %v1144_v9, %v1144_v9 }
 0x114   :  { %v865_v6 = vpop.f32.mrf.mxu0  ;;  %v889_v10 = vpop.f32.mrf.mxu1 }
 0x115   :  { %v1142_v8 = vadd.f32 %v865_v6, %v864_v2  ;;  %v1148_v12 = vadd.f32 %v889_v10, %v888_v7 }
 0x116   :  { %v867_v11 = vpop.f32.mrf.mxu0  ;;  %v891_v15 = vpop.f32.mrf.mxu1 }
 0x117   :  { %374 = vadd.xlane.f32.xlu1 %v1122_v56  ;;  %388 = vadd.xlane.f32.xlu0 %v1124_v57  ;;  %v421_v16 = vmul.f32 %v1142_v8, %v1142_v8  ;;  %v429_v21 = vmul.f32 %v1148_v12, %v1148_v12 }
 0x118   :  { %v868_v14 = vpop.f32.mrf.mxu0  ;;  %v892_v19 = vpop.f32.mrf.mxu1 }
 0x119   :  { %v1157_v20 = vadd.f32 %v868_v14, %v867_v11  ;;  %v1164_v25 = vadd.f32 %v892_v19, %v891_v15 }
 0x11a   :  { %v870_v18 = vpop.f32.mrf.mxu0  ;;  %v894_v23 = vpop.f32.mrf.mxu1 }
 0x11b   :  { %390 = vadd.xlane.f32.xlu1 %v1128_v60  ;;  %436 = vadd.xlane.f32.xlu0 %v418_v61  ;;  %v422_v28 = vmul.f32 %v1157_v20, %v1157_v20  ;;  %v430_v30 = vmul.f32 %v1164_v25, %v1164_v25 }
 0x11c   :  { %v871_v22 = vpop.f32.mrf.mxu0  ;;  %v895_v26 = vpop.f32.mrf.mxu1 }
 0x11d   :  { %v1162_v24 = vadd.f32 %v871_v22, %v870_v18  ;;  %v1168_v27 = vadd.f32 %v895_v26, %v894_v23 }
 0x11f   :  { %438 = vadd.xlane.f32.xlu1 %v419_v0  ;;  %452 = vadd.xlane.f32.xlu0 %v426_v1  ;;  %v423_v29 = vmul.f32 %v1162_v24, %v1162_v24  ;;  %v431_v31 = vmul.f32 %v1168_v27, %v1168_v27 }
 0x123   :  { %454 = vadd.xlane.f32.xlu1 %v427_v5  ;;  %376 = vadd.xlane.f32.xlu0 %v1137_v4 }
 0x127   :  { %378 = vadd.xlane.f32.xlu1 %v1142_v8  ;;  %392 = vadd.xlane.f32.xlu0 %v1144_v9 }
 0x12b   :  { %394 = vadd.xlane.f32.xlu1 %v1148_v12  ;;  %440 = vadd.xlane.f32.xlu0 %v420_v13 }
 0x12f   :  { %442 = vadd.xlane.f32.xlu1 %v421_v16  ;;  %456 = vadd.xlane.f32.xlu0 %v428_v17 }
 0x133   :  { %458 = vadd.xlane.f32.xlu1 %v429_v21  ;;  %380 = vadd.xlane.f32.xlu0 %v1157_v20 }
 0x137   :  { %382 = vadd.xlane.f32.xlu1 %v1162_v24  ;;  %396 = vadd.xlane.f32.xlu0 %v1164_v25 }
 0x13b   :  { %398 = vadd.xlane.f32.xlu1 %v1168_v27  ;;  %444 = vadd.xlane.f32.xlu0 %v422_v28 }
 0x13f   :  { %446 = vadd.xlane.f32.xlu1 %v423_v29  ;;  %460 = vadd.xlane.f32.xlu0 %v430_v30 }
 0x143   :  { %462 = vadd.xlane.f32.xlu1 %v431_v31 }
 0x18c   :  { %v369_v32 = vpop.xlane.xlu0 %368 }
 0x18d   :  { %v1179_v35 = vmul.f32 0.0078125, %v369_v32 }
 0x18f   :  { %v480_v39 = vmul.f32 %v1179_v35, %v1179_v35 }
 0x190   :  { %v387_v33 = vpop.xlane.xlu1 %386  ;;  %v385_v34 = vpop.xlane.xlu0 %384 }
 0x191   :  { %v409_v40 = vmul.f32 0.0078125, %v387_v33  ;;  %v408_v44 = vmul.f32 0.0078125, %v385_v34 }
 0x193   :  { %v489_v49 = vmul.f32 %v409_v40, %v409_v40  ;;  %v488_v50 = vmul.f32 %v408_v44, %v408_v44  ;;  %v521_v32 = vsub.f32 %v1106_v43, %v409_v40 }
 0x194   :  { %v435_v37 = vpop.xlane.xlu1 %434  ;;  %v433_v38 = vpop.xlane.xlu0 %432 }
 0x195   :  { %v464_v45 = vmul.f32 0.0078125, %v433_v38  ;;  %v465_v1 = vmul.f32 0.0078125, %v435_v37  ;;  %v520_v38 = vsub.f32 %v1102_v41, %v408_v44 }
 0x197   :  { %v496_v46 = vsub.f32 %v464_v45, %v480_v39 }
 0x198   :  { %v451_v47 = vpop.xlane.xlu1 %450  ;;  %v449_v48 = vpop.xlane.xlu0 %448 }
 0x199   :  { %v473_v51 = vmul.f32 0.0078125, %v451_v47  ;;  %v472_v52 = vmul.f32 0.0078125, %v449_v48  ;;  %v528_v54 = vadd.f32 1e-05, %v496_v46  ;;  %v512_v47 = vsub.f32 %v1099_v36, %v1179_v35  ;;  %v1212_v36 = vld [vmem:[%s1306_s3] ss:$0 sm:$0xff] }
 0x19b   :  { %v505_v55 = vsub.f32 %v473_v51, %v489_v49  ;;  %v504_v58 = vsub.f32 %v472_v52, %v488_v50  ;;  %960 = vrsqrt.f32 %v528_v54  ;;  %v1204_v51 = vld [vmem:[%s1305_s2] ss:$0 sm:$0xff]  ;;  %s1064_s2 = smov [#allocation7]  }
 0x19c   :  { %v373_v59 = vpop.xlane.xlu1 %372  ;;  %v371_v61 = vpop.xlane.xlu0 %370  ;;  %s707_s3 = sshll.u32 %s1064_s2, 4  ;;  %s708_s3 = int_to_ptr.vmem [resolvable:$true] %s707_s3 }
 0x19d   :  { %v537_v62 = vadd.f32 1e-05, %v505_v55  ;;  %v536_v63 = vadd.f32 1e-05, %v504_v58  ;;  %v401_v0 = vmul.f32 0.0078125, %v371_v61  ;;  %v1183_v6 = vmul.f32 0.0078125, %v373_v59  ;;  %p1037_p11 = scmp.lt.s32.totalorder %s708_s3, %s708_s3 }
 0x19e   :  { %s1032_s5 = scalar_lea.vmem %s708_s3, 1024 }
 0x19f   :  { %962 = vrsqrt.f32 %v537_v62  ;;  %v481_v2 = vmul.f32 %v401_v0, %v401_v0  ;;  %v482_v15 = vmul.f32 %v1183_v6, %v1183_v6  ;;  %v513_v61 = vsub.f32 %v1104_v42, %v401_v0  ;;  %p1033_p10 = scmp.ne.s32.totalorder %s708_s3, %s1032_s5  ;;  %p1038_p12 = scmp.lt.s32.totalorder %s1032_s5, %s1032_s5 }
 0x1a0   :  { %964 = vrsqrt.f32 %v536_v63  ;;  %v375_v3 = vpop.xlane.xlu1 %374  ;;  %v389_v5 = vpop.xlane.xlu0 %388 }
 0x1a1   :  { %v497_v7 = vsub.f32 %v465_v1, %v481_v2  ;;  %v1185_v11 = vmul.f32 0.0078125, %v375_v3  ;;  %v1189_v16 = vmul.f32 0.0078125, %v389_v5  ;;  %p1039_p13 = por %p1038_p12, %p1037_p11 }
 0x1a3   :  { %v529_v10 = vadd.f32 1e-05, %v497_v7  ;;  %v483_v19 = vmul.f32 %v1185_v11, %v1185_v11  ;;  %v490_v23 = vmul.f32 %v1189_v16, %v1189_v16  ;;  %p1040_p0 = pnand %p1039_p13, %p1033_p10 }
 0x1a4   :  { %v391_v13 = vpop.xlane.xlu1 %390  ;;  %v437_v14 = vpop.xlane.xlu0 %436 }
 0x1a5   :  { %966 = vrsqrt.f32 %v529_v10  ;;  %v466_v17 = vmul.f32 0.0078125, %v437_v14  ;;  %v1195_v30 = vmul.f32 0.0078125, %v391_v13 }
 0x1a7   :  { %v498_v18 = vsub.f32 %v466_v17, %v482_v15  ;;  %v491_v40 = vmul.f32 %v1195_v30, %v1195_v30 }
 0x1a8   :  { %v439_v21 = vpop.xlane.xlu1 %438  ;;  %v453_v22 = vpop.xlane.xlu0 %452 }
 0x1a9   :  { %v530_v26 = vadd.f32 1e-05, %v498_v18  ;;  %v467_v28 = vmul.f32 0.0078125, %v439_v21  ;;  %v474_v29 = vmul.f32 0.0078125, %v453_v22  ;;  %v961_v31 = vpop.eup %960  ;;  %v514_v18 = vsub.f32 %v1118_v53, %v1183_v6 }
 0x1aa   :  { %v560_v44 = vmul.f32 %v961_v31, %v512_v47 }
 0x1ab   :  { %968 = vrsqrt.f32 %v530_v26  ;;  %v499_v33 = vsub.f32 %v467_v28, %v483_v19  ;;  %v506_v34 = vsub.f32 %v474_v29, %v490_v23 }
 0x1ac   :  { %v963_v37 = vpop.eup %962  ;;  %v455_v39 = vpop.xlane.xlu1 %454  ;;  %v583_v3 = vmul.f32 %v1204_v51, %v560_v44 }
 0x1ad   :  { %v377_v45 = vpop.xlane.xlu0 %376  ;;  %v965_v46 = vpop.eup %964  ;;  %v569_v48 = vmul.f32 %v963_v37, %v521_v32  ;;  %v531_v49 = vadd.f32 1e-05, %v499_v33  ;;  %v538_v50 = vadd.f32 1e-05, %v506_v34  ;;  %v475_v52 = vmul.f32 0.0078125, %v455_v39 }
 0x1ae   :  { %v568_v43 = vmul.f32 %v965_v46, %v520_v38  ;;  %v1217_v62 = vmul.f32 0.0078125, %v377_v45  ;;  %v606_v19 = vadd.f32 %v1212_v36, %v583_v3  ;;  %v515_v38 = vsub.f32 %v1122_v56, %v1185_v11 }
 0x1af   :  { %v592_v41 = vmul.f32 %v1204_v51, %v569_v48  ;;  %970 = vrsqrt.f32 %v531_v49  ;;  %v507_v54 = vsub.f32 %v475_v52, %v491_v40  ;;  %v522_v46 = vsub.f32 %v1124_v57, %v1189_v16 }
 0x1b0   :  { %v591_v35 = vmul.f32 %v1204_v51, %v568_v43  ;;  %972 = vrsqrt.f32 %v538_v50  ;;  %v379_v55 = vpop.xlane.xlu1 %378  ;;  %v484_v42 = vmul.f32 %v1217_v62, %v1217_v62  ;;  %v523_v57 = vsub.f32 %v1128_v60, %v1195_v30 }
 0x1b1   :  { %v393_v58 = vpop.xlane.xlu0 %392  ;;  %v615_v59 = vadd.f32 %v1212_v36, %v592_v41  ;;  %v539_v2 = vadd.f32 1e-05, %v507_v54  ;;  %v1221_v10 = vmul.f32 0.0078125, %v379_v55 }
 0x1b2   :  { %v967_v63 = vpop.eup %966  ;;  %v614_v1 = vadd.f32 %v1212_v36, %v591_v35  ;;  %v1226_v17 = vmul.f32 0.0078125, %v393_v58 }
 0x1b3   :  { %v561_v5 = vmul.f32 %v967_v63, %v513_v61  ;;  %974 = vrsqrt.f32 %v539_v2  ;;  %v485_v26 = vmul.f32 %v1221_v10, %v1221_v10 }
 0x1b4   :  { %v809_v7 = vpack.c.bf16 %v615_v59, %v614_v1  ;;  %v395_v13 = vpop.xlane.xlu1 %394  ;;  %v492_v53 = vmul.f32 %v1226_v17, %v1226_v17 }
 0x1b5   :  { %v441_v14 = vpop.xlane.xlu0 %440  ;;  %v584_v15 = vmul.f32 %v1204_v51, %v561_v5  ;;  %v1234_v28 = vmul.f32 0.0078125, %v395_v13 }
 0x1b6   :  { %v468_v0 = vmul.f32 0.0078125, %v441_v14  ;;  %829 = vst [vmem:[#allocation7 + $0x20] sm:$0xff] %v809_v7  }
 0x1b7   :  { %v607_v21 = vadd.f32 %v1212_v36, %v584_v15  ;;  %v493_v47 = vmul.f32 %v1234_v28, %v1234_v28 }
 0x1b8   :  { %v500_v22 = vsub.f32 %v468_v0, %v484_v42  ;;  %v969_v23 = vpop.eup %968  ;;  %v443_v29 = vpop.xlane.xlu1 %442 }
 0x1b9   :  { %v457_v31 = vpop.xlane.xlu0 %456  ;;  %v789_v32 = vpack.c.bf16 %v607_v21, %v606_v19  ;;  %v562_v33 = vmul.f32 %v969_v23, %v514_v18  ;;  %v469_v37 = vmul.f32 0.0078125, %v443_v29  ;;  %v516_v19 = vsub.f32 %v1137_v4, %v1217_v62 }
 0x1ba   :  { %v532_v34 = vadd.f32 1e-05, %v500_v22  ;;  %v476_v6 = vmul.f32 0.0078125, %v457_v31  ;;  %v517_v4 = vsub.f32 %v1142_v8, %v1221_v10  ;;  %v525_v8 = vsub.f32 %v1148_v12, %v1234_v28 }
 0x1bb   :  { %790 = vst [vmem:[#allocation7] sm:$0xff] %v789_v32   ;;  %v501_v39 = vsub.f32 %v469_v37, %v485_v26  ;;  %v585_v40 = vmul.f32 %v1204_v51, %v562_v33 }
 0x1bc   :  { %976 = vrsqrt.f32 %v532_v34  ;;  %v971_v45 = vpop.eup %970  ;;  %v508_v48 = vsub.f32 %v476_v6, %v492_v53  ;;  %v459_v49 = vpop.xlane.xlu1 %458 }
 0x1bd   :  { %v381_v50 = vpop.xlane.xlu0 %380  ;;  %v973_v43 = vpop.eup %972  ;;  %v563_v52 = vmul.f32 %v971_v45, %v515_v38  ;;  %v533_v41 = vadd.f32 1e-05, %v501_v39  ;;  %v477_v44 = vmul.f32 0.0078125, %v459_v49  ;;  %v608_v59 = vadd.f32 %v1212_v36, %v585_v40 }
 0x1be   :  { %v570_v35 = vmul.f32 %v973_v43, %v522_v46  ;;  %v540_v56 = vadd.f32 1e-05, %v508_v48  ;;  %v1250_v1 = vmul.f32 0.0078125, %v381_v50  ;;  %v524_v45 = vsub.f32 %v1144_v9, %v1226_v17 }
 0x1bf   :  { %v586_v11 = vmul.f32 %v1204_v51, %v563_v52  ;;  %978 = vrsqrt.f32 %v533_v41  ;;  %v509_v54 = vsub.f32 %v477_v44, %v493_v47 }
 0x1c0   :  { %980 = vrsqrt.f32 %v540_v56  ;;  %v383_v16 = vpop.xlane.xlu1 %382  ;;  %v975_v58 = vpop.eup %974  ;;  %v593_v2 = vmul.f32 %v1204_v51, %v570_v35  ;;  %v486_v15 = vmul.f32 %v1250_v1, %v1250_v1 }
 0x1c1   :  { %v397_v55 = vpop.xlane.xlu0 %396  ;;  %v609_v61 = vadd.f32 %v1212_v36, %v586_v11  ;;  %v541_v63 = vadd.f32 1e-05, %v509_v54  ;;  %v571_v3 = vmul.f32 %v975_v58, %v523_v57  ;;  %v1254_v13 = vmul.f32 0.0078125, %v383_v16 }
 0x1c2   :  { %v1256_v60 = vmul.f32 0.0078125, %v397_v55  ;;  %v616_v0 = vadd.f32 %v1212_v36, %v593_v2  ;;  %v518_v58 = vsub.f32 %v1157_v20, %v1250_v1 }
 0x1c3   :  { %v794_v5 = vpack.c.bf16 %v609_v61, %v608_v59  ;;  %982 = vrsqrt.f32 %v541_v63  ;;  %v594_v7 = vmul.f32 %v1204_v51, %v571_v3  ;;  %v487_v26 = vmul.f32 %v1254_v13, %v1254_v13 }
 0x1c4   :  { %v399_v30 = vpop.xlane.xlu1 %398  ;;  %v494_v29 = vmul.f32 %v1256_v60, %v1256_v60  ;;  %v519_v63 = vsub.f32 %v1162_v24, %v1254_v13  ;;  %v526_v3 = vsub.f32 %v1164_v25, %v1256_v60 }
 0x1c5   :  { %v445_v14 = vpop.xlane.xlu0 %444  ;;  %826 = vst [vmem:[#allocation7 + $0x8] sm:$0xff] %v794_v5   ;;  %v617_v18 = vadd.f32 %v1212_v36, %v594_v7  ;;  %v415_v6 = vmul.f32 0.0078125, %v399_v30 }
 0x1c6   :  { %v470_v42 = vmul.f32 0.0078125, %v445_v14 }
 0x1c7   :  { %v814_v23 = vpack.c.bf16 %v617_v18, %v616_v0  ;;  %v495_v52 = vmul.f32 %v415_v6, %v415_v6 }
 0x1c8   :  { %v502_v21 = vsub.f32 %v470_v42, %v486_v15  ;;  %v447_v31 = vpop.xlane.xlu1 %446  ;;  %v527_v42 = vsub.f32 %v1168_v27, %v415_v6 }
 0x1c9   :  { %v977_v22 = vpop.eup %976  ;;  %v461_v32 = vpop.xlane.xlu0 %460  ;;  %v471_v37 = vmul.f32 0.0078125, %v447_v31  ;;  %830 = vst [vmem:[#allocation7 + $0x28] sm:$0xff] %v814_v23  }
 0x1ca   :  { %v564_v33 = vmul.f32 %v977_v22, %v516_v19  ;;  %v534_v34 = vadd.f32 1e-05, %v502_v21  ;;  %v478_v53 = vmul.f32 0.0078125, %v461_v32 }
 0x1cb   :  { %v503_v62 = vsub.f32 %v471_v37, %v487_v26 }
 0x1cc   :  { %984 = vrsqrt.f32 %v534_v34  ;;  %v510_v38 = vsub.f32 %v478_v53, %v494_v29  ;;  %v979_v39 = vpop.eup %978  ;;  %v463_v46 = vpop.xlane.xlu1 %462  ;;  %v587_v48 = vmul.f32 %v1204_v51, %v564_v33 }
 0x1cd   :  { %v981_v47 = vpop.eup %980  ;;  %v565_v49 = vmul.f32 %v979_v39, %v517_v4  ;;  %v535_v50 = vadd.f32 1e-05, %v503_v62  ;;  %v479_v41 = vmul.f32 0.0078125, %v463_v46 }
 0x1ce   :  { %v542_v43 = vadd.f32 1e-05, %v510_v38  ;;  %v572_v40 = vmul.f32 %v981_v47, %v524_v45  ;;  %v610_v9 = vadd.f32 %v1212_v36, %v587_v48 }
 0x1cf   :  { %v588_v10 = vmul.f32 %v1204_v51, %v565_v49  ;;  %986 = vrsqrt.f32 %v535_v50  ;;  %v511_v35 = vsub.f32 %v479_v41, %v495_v52 }
 0x1d0   :  { %v983_v44 = vpop.eup %982  ;;  %988 = vrsqrt.f32 %v542_v43  ;;  %v595_v56 = vmul.f32 %v1204_v51, %v572_v40 }
 0x1d1   :  { %v611_v17 = vadd.f32 %v1212_v36, %v588_v10  ;;  %v573_v11 = vmul.f32 %v983_v44, %v525_v8  ;;  %v543_v54 = vadd.f32 1e-05, %v511_v35 }
 0x1d2   :  { %v618_v12 = vadd.f32 %v1212_v36, %v595_v56 }
 0x1d3   :  { %v799_v57 = vpack.c.bf16 %v611_v17, %v610_v9  ;;  %v596_v16 = vmul.f32 %v1204_v51, %v573_v11  ;;  %990 = vrsqrt.f32 %v543_v54 }
 0x1d5   :  { %827 = vst [vmem:[#allocation7 + $0x10] sm:$0xff] %v799_v57   ;;  %v619_v28 = vadd.f32 %v1212_v36, %v596_v16 }
 0x1d7   :  { %v819_v55 = vpack.c.bf16 %v619_v28, %v618_v12 }
 0x1d9   :  { %v985_v59 = vpop.eup %984  ;;  %831 = vst [vmem:[#allocation7 + $0x30] sm:$0xff] %v819_v55  }
 0x1da   :  { %v566_v61 = vmul.f32 %v985_v59, %v518_v58 }
 0x1dc   :  { %v987_v2 = vpop.eup %986  ;;  %v589_v7 = vmul.f32 %v1204_v51, %v566_v61 }
 0x1dd   :  { %v989_v5 = vpop.eup %988  ;;  %v567_v30 = vmul.f32 %v987_v2, %v519_v63 }
 0x1de   :  { %v574_v14 = vmul.f32 %v989_v5, %v526_v3  ;;  %v612_v1 = vadd.f32 %v1212_v36, %v589_v7 }
 0x1df   :  { %v590_v15 = vmul.f32 %v1204_v51, %v567_v30 }
 0x1e0   :  { %v991_v20 = vpop.eup %990  ;;  %v597_v24 = vmul.f32 %v1204_v51, %v574_v14 }
 0x1e1   :  { %v613_v0 = vadd.f32 %v1212_v36, %v590_v15  ;;  %v575_v13 = vmul.f32 %v991_v20, %v527_v42 }
 0x1e2   :  { %v620_v60 = vadd.f32 %v1212_v36, %v597_v24 }
 0x1e3   :  { %v804_v18 = vpack.c.bf16 %v613_v0, %v612_v1  ;;  %v598_v25 = vmul.f32 %v1204_v51, %v575_v13 }
 0x1e5   :  { %828 = vst [vmem:[#allocation7 + $0x18] sm:$0xff] %v804_v18   ;;  %v621_v19 = vadd.f32 %v1212_v36, %v598_v25 }
 0x1e7   :  { %v824_v21 = vpack.c.bf16 %v621_v19, %v620_v60 }
 0x1e9   :  { %832 = vst [vmem:[#allocation7 + $0x38] sm:$0xff] %v824_v21  }
 0x1ea   :  { %1043 = shalt.err (!%p1040_p0)
}
 0x1eb   :  { %713 = dma.vmem_to_hbm [thread:$0]  %s708_s3, 1024, %s1307_s4, [#allocation4], %s1062_s25, %s1062_s25, %s1063_s26  }
 0x1ec   :  { %1056 = dma.done.wait [#allocation4], 1024  }
 0x1ed   :  { %1057 = vsyncadd [#allocation4], 4294966272 }
 0x1ee   :  { %717 = vsyncpa [#allocation3], 1 }
 0x1ef   :  { %718 = vsyncpa [#allocation6], 1 }
 0x1f0   :  { %719 = vsyncpa [#allocation4], 1 }

</bundles_post_ra>
